<compile_context>
chip_gen: v7x
topology: tpu7x:2x2x1
jax: 0.10.0
libtpu: 0.0.40
codegen_flags: <defaults>
</compile_context>

<pallas_src>
import functools

import jax
import jax.numpy as jnp
from jax.experimental import pallas as pl
from jax.experimental.pallas import tpu as pltpu


def _reparam_kernel(x_ref, wcat_ref, bcat_ref, eps_ref,
                    z_ref, mu_ref, lv_ref, acc_ref,
                    *, use_activation: bool, tn: int):
    k = pl.program_id(2)

    @pl.when(k == 0)
    def _init():
        acc_ref[...] = jnp.zeros_like(acc_ref)

    # Fused GEMM: one MXU pass produces the (mu | var) concatenated tile.
    x = x_ref[...].astype(wcat_ref.dtype)   # bf16 MXU inputs, f32 accumulate
    acc_ref[...] += jnp.dot(x, wcat_ref[...], preferred_element_type=jnp.float32)

    @pl.when(k == pl.num_programs(2) - 1)
    def _epilogue():
        acc = acc_ref[...] + bcat_ref[...]          # bias add in f32
        mu = acc[:, :tn]
        var_lin = acc[:, tn:]
        if use_activation:
            log_var = jax.nn.softplus(var_lin)      # stable logaddexp(x, 0), f32
        else:
            log_var = var_lin
        mu_ref[...] = mu.astype(mu_ref.dtype)
        lv_ref[...] = log_var.astype(lv_ref.dtype)
        # Normal(mu, scale=log_var).rsample() == mu + log_var * eps
        z_ref[...] = (mu + log_var * eps_ref[...]).astype(z_ref.dtype)


def _pick_tile(dim, candidates):
    for t in candidates:
        if dim % t == 0:
            return t
    return dim  # fall back to full extent (legal block shape)


def reparam_layer(x, w_mu, b_mu, w_var, b_var, eps, *,
                  mu_coef: float = 1.0, var_coef: float = 1.0,
                  use_activation: bool = True,
                  weight_dtype=jnp.bfloat16,
                  tm=None, tn=None, tk=None):
    """Pallas forward of ReparamLayer.

    x:     (B, D) float32
    w_mu:  (D, D) float32   (pre-transposed: y = x @ w_mu + b_mu)
    b_mu:  (1, D) or (D,) float32
    w_var: (D, D) float32
    b_var: (1, D) or (D,) float32
    eps:   (B, D) float32 standard-normal noise (rsample noise)
    returns (z, mu, log_var), each (B, D) float32
    """
    del mu_coef, var_coef  # stored by the PyTorch module but unused in forward
    B, D = x.shape
    b_mu = b_mu.reshape(1, D)
    b_var = b_var.reshape(1, D)

    # Tile selection (overridable). 256-aligned N/K preferred for v6e/v7x MXU,
    # 128 fallback for v5e-sized dims, full-extent fallback for small D.
    tm = tm or _pick_tile(B, (256, 128, 64, 32, 16, 8))
    tn = tn or _pick_tile(D, (256, 128))
    tk = tk or _pick_tile(D, (512, 256, 128))
    nj = D // tn

    # Fuse fc_mu / fc_var weights into one (D, 2D) matrix, interleaved per
    # N-tile so block j holds [w_mu[:, jtile] | w_var[:, jtile]] contiguously.
    w_cat = jnp.stack([w_mu.reshape(D, nj, tn), w_var.reshape(D, nj, tn)],
                      axis=2).reshape(D, 2 * D).astype(weight_dtype)
    b_cat = jnp.stack([b_mu.reshape(nj, tn), b_var.reshape(nj, tn)],
                      axis=1).reshape(1, 2 * D).astype(jnp.float32)

    grid = (B // tm, D // tn, D // tk)
    out_sds = jax.ShapeDtypeStruct((B, D), jnp.float32)
    kernel = functools.partial(_reparam_kernel,
                               use_activation=use_activation, tn=tn)

    z, mu, log_var = pl.pallas_call(
        kernel,
        out_shape=(out_sds, out_sds, out_sds),
        grid_spec=pltpu.PrefetchScalarGridSpec(
            num_scalar_prefetch=0,
            grid=grid,
            in_specs=[
                pl.BlockSpec((tm, tk), lambda i, j, k: (i, k)),       # x
                pl.BlockSpec((tk, 2 * tn), lambda i, j, k: (k, j)),   # fused W
                pl.BlockSpec((1, 2 * tn), lambda i, j, k: (0, j)),    # fused b
                pl.BlockSpec((tm, tn), lambda i, j, k: (i, j)),       # eps
            ],
            out_specs=(
                pl.BlockSpec((tm, tn), lambda i, j, k: (i, j)),       # z
                pl.BlockSpec((tm, tn), lambda i, j, k: (i, j)),       # mu
                pl.BlockSpec((tm, tn), lambda i, j, k: (i, j)),       # log_var
            ),
            scratch_shapes=[pltpu.VMEM((tm, 2 * tn), jnp.float32)],
        ),
        compiler_params=pltpu.CompilerParams(
            dimension_semantics=("parallel", "parallel", "arbitrary")),
    )(x, w_cat, b_cat, eps)
    return z, mu, log_var


def init_params(key, input_dim):
    """Deterministic nn.Linear-style init (uniform(-1/sqrt(D), 1/sqrt(D)))."""
    k1, k2, k3, k4 = jax.random.split(key, 4)
    bound = 1.0 / jnp.sqrt(float(input_dim))
    w_mu = jax.random.uniform(k1, (input_dim, input_dim), jnp.float32, -bound, bound)
    b_mu = jax.random.uniform(k2, (1, input_dim), jnp.float32, -bound, bound)
    w_var = jax.random.uniform(k3, (input_dim, input_dim), jnp.float32, -bound, bound)
    b_var = jax.random.uniform(k4, (1, input_dim), jnp.float32, -bound, bound)
    return w_mu, b_mu, w_var, b_var


if __name__ == "__main__":
    key = jax.random.PRNGKey(0)
    kx, kp, ke = jax.random.split(key, 3)

    batch, input_dim = 8, 128   # lane-aligned feature dim (avoid sub-128 lanes)
    x = jax.random.normal(kx, (batch, input_dim), dtype=jnp.float32)
    w_mu, b_mu, w_var, b_var = init_params(kp, input_dim)
    eps = jax.random.normal(ke, (batch, input_dim), dtype=jnp.float32)

    z, mu, log_var = reparam_layer(x, w_mu, b_mu, w_var, b_var, eps,
                                   mu_coef=1.0, var_coef=1.0,
                                   use_activation=True)
    jax.block_until_ready((z, mu, log_var))

    # Pure-JAX reference with the same bf16 operand rounding / f32 accumulation.
    def q(a):
        return a.astype(jnp.bfloat16).astype(jnp.float32)

    mu_ref = q(x) @ q(w_mu) + b_mu
    lv_ref = jax.nn.softplus(q(x) @ q(w_var) + b_var)
    z_ref = mu_ref + lv_ref * eps

    assert jnp.allclose(mu, mu_ref, atol=2e-3, rtol=2e-3)
    assert jnp.allclose(log_var, lv_ref, atol=2e-3, rtol=2e-3)
    assert jnp.allclose(z, z_ref, atol=2e-3, rtol=2e-3)

    print("KERNEL_OK")
</pallas_src>

<mosaic_0001>
module attributes {stable_mosaic.version = 11 : i64} {
  func.func @_reparam_kernel(%arg0: i32, %arg1: i32, %arg2: i32, %arg3: memref<8x128xf32, #tpu.memory_space<vmem>>, %arg4: memref<128x256xbf16, #tpu.memory_space<vmem>>, %arg5: memref<1x256xf32, #tpu.memory_space<vmem>>, %arg6: memref<8x128xf32, #tpu.memory_space<vmem>>, %arg7: memref<8x128xf32, #tpu.memory_space<vmem>>, %arg8: memref<8x128xf32, #tpu.memory_space<vmem>>, %arg9: memref<8x128xf32, #tpu.memory_space<vmem>>, %arg10: memref<8x256xf32, #tpu.memory_space<vmem>>) attributes {dimension_semantics = [#tpu.dimension_semantics<parallel>, #tpu.dimension_semantics<parallel>, #tpu.dimension_semantics<arbitrary>], iteration_bounds = array<i64: 1, 1, 1>, scalar_prefetch = 0 : i64, scratch_operands = 1 : i64, tpu.core_type = #tpu.core_type<tc>, window_params = [{transform_indices = @transform_0, window_bounds = array<i64: 8, 128>}, {transform_indices = @transform_1, window_bounds = array<i64: 128, 256>}, {transform_indices = @transform_2, window_bounds = array<i64: 1, 256>}, {transform_indices = @transform_3, window_bounds = array<i64: 8, 128>}, {transform_indices = @transform_4, window_bounds = array<i64: 8, 128>}, {transform_indices = @transform_5, window_bounds = array<i64: 8, 128>}, {transform_indices = @transform_6, window_bounds = array<i64: 8, 128>}]} {
    %c0_i32 = arith.constant 0 : i32
    %0 = arith.cmpi eq, %arg2, %c0_i32 : i32
    %1 = arith.extui %0 : i1 to i32
    %c0_i32_0 = arith.constant 0 : i32
    %2 = arith.cmpi ne, %1, %c0_i32_0 : i32
    scf.if %2 {
      %cst_10 = arith.constant 0.000000e+00 : f32
      %13 = vector.broadcast %cst_10 : f32 to vector<8x256xf32>
      %c0_11 = arith.constant 0 : index
      %c0_12 = arith.constant 0 : index
      %14 = vector.load %arg10[%c0_11, %c0_12] : memref<8x256xf32, #tpu.memory_space<vmem>>, vector<8x256xf32>
      tpu.vector_store %arg10[%c0_11, %c0_12], %13 {strides = array<i32>} : memref<8x256xf32, #tpu.memory_space<vmem>>, vector<8x256xf32>,
    } else {
    }
    %c0 = arith.constant 0 : index
    %c0_1 = arith.constant 0 : index
    %3 = vector.load %arg3[%c0, %c0_1] : memref<8x128xf32, #tpu.memory_space<vmem>>, vector<8x128xf32>
    %4 = arith.truncf %3 : vector<8x128xf32> to vector<8x128xbf16>
    %c0_2 = arith.constant 0 : index
    %c0_3 = arith.constant 0 : index
    %5 = vector.load %arg10[%c0_2, %c0_3] : memref<8x256xf32, #tpu.memory_space<vmem>>, vector<8x256xf32>
    %c0_4 = arith.constant 0 : index
    %c0_5 = arith.constant 0 : index
    %6 = vector.load %arg4[%c0_4, %c0_5] : memref<128x256xbf16, #tpu.memory_space<vmem>>, vector<128x256xbf16>
    %cst = arith.constant dense<0.000000e+00> : vector<8x256xf32>
    %7 = tpu.matmul %4, %6, %cst {dimension_numbers = #tpu.dot_dimension_numbers<[1], [0], [0], [1], [0, 0, 1, 1], [], []>} : vector<8x128xbf16>, vector<128x256xbf16>, vector<8x256xf32> -> vector<8x256xf32>
    %8 = arith.addf %5, %7 : vector<8x256xf32>
    %c0_6 = arith.constant 0 : index
    %c0_7 = arith.constant 0 : index
    %9 = vector.load %arg10[%c0_6, %c0_7] : memref<8x256xf32, #tpu.memory_space<vmem>>, vector<8x256xf32>
    tpu.vector_store %arg10[%c0_6, %c0_7], %8 {strides = array<i32>} : memref<8x256xf32, #tpu.memory_space<vmem>>, vector<8x256xf32>,
    %c0_i32_8 = arith.constant 0 : i32
    %10 = arith.cmpi eq, %arg2, %c0_i32_8 : i32
    %11 = arith.extui %10 : i1 to i32
    %c0_i32_9 = arith.constant 0 : i32
    %12 = arith.cmpi ne, %11, %c0_i32_9 : i32
    scf.if %12 {
      %c0_10 = arith.constant 0 : index
      %c0_11 = arith.constant 0 : index
      %13 = vector.load %arg10[%c0_10, %c0_11] : memref<8x256xf32, #tpu.memory_space<vmem>>, vector<8x256xf32>
      %c0_12 = arith.constant 0 : index
      %c0_13 = arith.constant 0 : index
      %14 = vector.load %arg5[%c0_12, %c0_13] : memref<1x256xf32, #tpu.memory_space<vmem>>, vector<1x256xf32>
      %15 = vector.broadcast %14 : vector<1x256xf32> to vector<8x256xf32>
      %16 = arith.addf %13, %15 : vector<8x256xf32>
      %17 = vector.extract_strided_slice %16 {offsets = [0, 0], sizes = [8, 128], strides = [1, 1]} : vector<8x256xf32> to vector<8x128xf32>
      %18 = vector.extract_strided_slice %16 {offsets = [0, 128], sizes = [8, 128], strides = [1, 1]} : vector<8x256xf32> to vector<8x128xf32>
      %cst_14 = arith.constant 0.000000e+00 : f32
      %19 = vector.broadcast %cst_14 : f32 to vector<8x128xf32>
      %20 = arith.maximumf %18, %19 : vector<8x128xf32>
      %21 = vector.broadcast %cst_14 : f32 to vector<8x128xf32>
      %22 = arith.subf %18, %21 : vector<8x128xf32>
      %23 = arith.cmpf one, %22, %22 : vector<8x128xf32>
      %24 = vector.broadcast %cst_14 : f32 to vector<8x128xf32>
      %25 = arith.addf %18, %24 : vector<8x128xf32>
      %26 = math.absf %22 : vector<8x128xf32>
      %cst_15 = arith.constant 0.000000e+00 : f32
      %27 = vector.broadcast %cst_15 : f32 to vector<8x128xf32>
      %28 = arith.subf %27, %26 : vector<8x128xf32>
      %29 = math.exp %28 : vector<8x128xf32>
      %30 = math.log1p %29 : vector<8x128xf32>
      %31 = arith.addf %20, %30 : vector<8x128xf32>
      %32 = arith.select %23, %25, %31 : vector<8x128xi1>, vector<8x128xf32>
      %c0_16 = arith.constant 0 : index
      %c0_17 = arith.constant 0 : index
      %33 = vector.load %arg8[%c0_16, %c0_17] : memref<8x128xf32, #tpu.memory_space<vmem>>, vector<8x128xf32>
      tpu.vector_store %arg8[%c0_16, %c0_17], %17 {strides = array<i32>} : memref<8x128xf32, #tpu.memory_space<vmem>>, vector<8x128xf32>,
      %c0_18 = arith.constant 0 : index
      %c0_19 = arith.constant 0 : index
      %34 = vector.load %arg9[%c0_18, %c0_19] : memref<8x128xf32, #tpu.memory_space<vmem>>, vector<8x128xf32>
      tpu.vector_store %arg9[%c0_18, %c0_19], %32 {strides = array<i32>} : memref<8x128xf32, #tpu.memory_space<vmem>>, vector<8x128xf32>,
      %c0_20 = arith.constant 0 : index
      %c0_21 = arith.constant 0 : index
      %35 = vector.load %arg6[%c0_20, %c0_21] : memref<8x128xf32, #tpu.memory_space<vmem>>, vector<8x128xf32>
      %36 = arith.mulf %32, %35 : vector<8x128xf32>
      %37 = arith.addf %17, %36 : vector<8x128xf32>
      %c0_22 = arith.constant 0 : index
      %c0_23 = arith.constant 0 : index
      %38 = vector.load %arg7[%c0_22, %c0_23] : memref<8x128xf32, #tpu.memory_space<vmem>>, vector<8x128xf32>
      tpu.vector_store %arg7[%c0_22, %c0_23], %37 {strides = array<i32>} : memref<8x128xf32, #tpu.memory_space<vmem>>, vector<8x128xf32>,
    } else {
    }
    return
  }
  func.func @transform_0(%arg0: i32, %arg1: i32, %arg2: i32) -> (i32, i32) {
    %c0_i32 = arith.constant 0 : i32
    return %arg0, %arg2 : i32, i32
  }
  func.func @transform_1(%arg0: i32, %arg1: i32, %arg2: i32) -> (i32, i32) {
    %c0_i32 = arith.constant 0 : i32
    return %arg2, %arg1 : i32, i32
  }
  func.func @transform_2(%arg0: i32, %arg1: i32, %arg2: i32) -> (i32, i32) {
    %c0_i32 = arith.constant 0 : i32
    %c0_i32_0 = arith.constant 0 : i32
    return %c0_i32, %arg1 : i32, i32
  }
  func.func @transform_3(%arg0: i32, %arg1: i32, %arg2: i32) -> (i32, i32) {
    %c0_i32 = arith.constant 0 : i32
    return %arg0, %arg1 : i32, i32
  }
  func.func @transform_4(%arg0: i32, %arg1: i32, %arg2: i32) -> (i32, i32) {
    %c0_i32 = arith.constant 0 : i32
    return %arg0, %arg1 : i32, i32
  }
  func.func @transform_5(%arg0: i32, %arg1: i32, %arg2: i32) -> (i32, i32) {
    %c0_i32 = arith.constant 0 : i32
    return %arg0, %arg1 : i32, i32
  }
  func.func @transform_6(%arg0: i32, %arg1: i32, %arg2: i32) -> (i32, i32) {
    %c0_i32 = arith.constant 0 : i32
    return %arg0, %arg1 : i32, i32
  }
}

</mosaic_0001>

<bundles_post_ra>
// kernel: tpu_custom_call.1
= control target key start
LH: loop header
LB: loop body
LE: loop exit
PB: predicated region body
PF: predicated region fallthrough
CT: control target
= control target key end

     0   :  { %12 = vsyncpa [#allocation4], 0  ;;  %s572_s0 = inlined_call_operand.hbm [shape: f32[8,128], index: 0, kind: input, shape index: {}]   ;;  %s573_s1 = inlined_call_operand.hbm [shape: bf16[128,256], index: 1, kind: input, shape index: {}]   ;;  %s574_s2 = inlined_call_operand.vmem [shape: f32[1,256], index: 2, kind: input, shape index: {}]   ;;  %s575_s3 = inlined_call_operand.vmem [shape: f32[8,128], index: 3, kind: input, shape index: {}]   ;;  %s576_s4 = inlined_call_operand.hbm [shape: f32[8,128], index: 4, kind: output, shape index: {0}]   ;;  %s577_s5 = inlined_call_operand.hbm [shape: f32[8,128], index: 5, kind: output, shape index: {1}]   ;;  %s578_s6 = inlined_call_operand.hbm [shape: f32[8,128], index: 6, kind: output, shape index: {2}]  }
   0x1   :  { %13 = vsyncpa [#allocation7], 0 }
   0x2   :  { %14 = vsyncpa [#allocation5], 0 }
   0x3   :  { %15 = vsyncpa [#allocation10], 0  ;;  %s456_s21 = smov [#allocation3]   ;;  %s457_s23 = smov [#allocation6]  }
   0x4   :  { %s22_s22 = sshll.u32 %s456_s21, 4  ;;  %s31_s24 = sshll.u32 %s457_s23, 4  ;;  %s23_s22 = int_to_ptr.vmem [resolvable:$true] %s22_s22  ;;  %s499_s24 = int_to_ptr.vmem [resolvable:$true] %s31_s24 }
   0x5   :  { %s338_s27 = scalar_lea.hbm %s572_s0, 128 }
   0x6   :  { %p339_p0 = scmp.ne.s32.totalorder %s572_s0, %s338_s27  ;;  %p342_p1 = scmp.lt.u32.totalorder %s338_s27, %s572_s0 }
   0x8   :  { %p344_p2 = pnand %p342_p1, %p339_p0 }
   0xa   :  { %347 = shalt.err (!%p344_p2)
}
   0xb   :  { %s348_s8 = scalar_lea.vmem %s23_s22, 128  ;;  %p353_p4 = scmp.lt.s32.totalorder %s23_s22, %s23_s22 }
   0xc   :  { %p349_p3 = scmp.ne.s32.totalorder %s23_s22, %s348_s8  ;;  %p354_p5 = scmp.lt.s32.totalorder %s348_s8, %s348_s8 }
   0xe   :  { %p355_p6 = por %p354_p5, %p353_p4 }
  0x10   :  { %p356_p7 = pnand %p355_p6, %p349_p3 }
  0x12   :  { %359 = shalt.err (!%p356_p7)
}
  0x13   :  { %25 = dma.hbm_to_vmem [thread:$0]  %s572_s0, 128, %s23_s22, [#allocation4]  }
  0x14   :  { %s360_s13 = scalar_lea.hbm %s573_s1, 2048 }
  0x15   :  { %p361_p8 = scmp.ne.s32.totalorder %s573_s1, %s360_s13  ;;  %p364_p9 = scmp.lt.u32.totalorder %s360_s13, %s573_s1 }
  0x17   :  { %p366_p10 = pnand %p364_p9, %p361_p8 }
  0x19   :  { %369 = shalt.err (!%p366_p10)
}
  0x1a   :  { %s370_s18 = scalar_lea.vmem %s499_s24, 2048  ;;  %p375_p12 = scmp.lt.s32.totalorder %s499_s24, %s499_s24 }
  0x1b   :  { %p371_p11 = scmp.ne.s32.totalorder %s499_s24, %s370_s18  ;;  %p376_p13 = scmp.lt.s32.totalorder %s370_s18, %s370_s18 }
  0x1d   :  { %p377_p0 = por %p376_p13, %p375_p12 }
  0x1f   :  { %p378_p1 = pnand %p377_p0, %p371_p11 }
  0x21   :  { %381 = shalt.err (!%p378_p1)
}
  0x22   :  { %s458_s0 = smov 128   ;;  %s459_s19 = smov 8  }
  0x23   :  { %37 = dma.hbm_to_vmem [thread:$0]  %s573_s1, 2048, %s499_s24, [#allocation7], %s458_s0, %s458_s0, %s459_s19  }
  0x24   :  { %448 = dma.done.wait [#allocation4], 128  }
  0x25   :  { %449 = vsyncadd [#allocation4], 4294967168 }
  0x26   :  { %450 = dma.done.wait [#allocation7], 2048  }
  0x27   :  { %451 = vsyncadd [#allocation7], 4294965248  ;;  %v460_v0 = vmov 0   ;;  %v310_v1 = vld [vmem:[#allocation6 + $0x4] ss:$8 sps:$4 sm:$0xff]   ;;  %v55_v17 = vld [vmem:[#allocation3] sm:$0xff]  ;;  %v207_v19 = vlaneseq }
  0x28   :  { %187 = vmatprep.mubr.bf16.mxu0 %v460_v0  ;;  %v312_v2 = vld [vmem:[#allocation6] ss:$8 sps:$4 sm:$0xff]   ;;  %155 = vmatprep.subr.bf16.mxu0 %v310_v1  ;;  %v313_v3 = vld [vmem:[#allocation6 + $0x14] ss:$8 sps:$4 sm:$0xff]   ;;  %v315_v4 = vld [vmem:[#allocation6 + $0x10] ss:$8 sps:$4 sm:$0xff]   ;;  %v56_v18 = vpack.c.bf16 %v55_v17, %v55_v17 }
  0x29   :  { %156 = vmatpush1.bf16.msra.mxu0 %v312_v2  ;;  %v316_v5 = vld [vmem:[#allocation6 + $0x24] ss:$8 sps:$4 sm:$0xff]   ;;  %v318_v6 = vld [vmem:[#allocation6 + $0x20] ss:$8 sps:$4 sm:$0xff]   ;;  %v319_v7 = vld [vmem:[#allocation6 + $0x34] ss:$8 sps:$4 sm:$0xff]  }
  0x2a   :  { %157 = vmatprep.subr.bf16.mxu0 %v313_v3  ;;  %v321_v8 = vld [vmem:[#allocation6 + $0x30] ss:$8 sps:$4 sm:$0xff]   ;;  %v322_v9 = vld [vmem:[#allocation6 + $0x44] ss:$8 sps:$4 sm:$0xff]   ;;  %v324_v10 = vld [vmem:[#allocation6 + $0x40] ss:$8 sps:$4 sm:$0xff]  }
  0x2b   :  { %v325_v11 = vld [vmem:[#allocation6 + $0x54] ss:$8 sps:$4 sm:$0xff]   ;;  %v327_v12 = vld [vmem:[#allocation6 + $0x50] ss:$8 sps:$4 sm:$0xff]   ;;  %v328_v13 = vld [vmem:[#allocation6 + $0x64] ss:$8 sps:$4 sm:$0xff]  }
  0x2c   :  { %v330_v14 = vld [vmem:[#allocation6 + $0x60] ss:$8 sps:$4 sm:$0xff]   ;;  %v331_v15 = vld [vmem:[#allocation6 + $0x74] ss:$8 sps:$4 sm:$0xff]   ;;  %v333_v16 = vld [vmem:[#allocation6 + $0x70] ss:$8 sps:$4 sm:$0xff]  }
  0x2d   :  { %158 = vmatpush1.bf16.msra.mxu0 %v315_v4  ;;  %v208_v20 = vshrl.u32 %v207_v19, 7  ;;  %v205_v22 = vld [vmem:[%s574_s2] sm:$0x3]  ;;  %s461_s23 = smov [#allocation9]  }
  0x2e   :  { %159 = vmatprep.subr.bf16.mxu0 %v316_v5  ;;  %s259_s24 = sshll.u32 %s461_s23, 4  ;;  %s260_s24 = int_to_ptr.vmem [resolvable:$true] %s259_s24 }
  0x2f   :  { %v209_v21 = vsub.s32 0, %v208_v20  ;;  %v213_v23 = vsub.s32 1, %v208_v20  ;;  %s382_s25 = scalar_lea.vmem %s260_s24, 128  ;;  %p387_p3 = scmp.lt.s32.totalorder %s260_s24, %s260_s24 }
  0x30   :  { %p383_p2 = scmp.ne.s32.totalorder %s260_s24, %s382_s25  ;;  %p388_p4 = scmp.lt.s32.totalorder %s382_s25, %s382_s25 }
  0x31   :  { %160 = vmatpush1.bf16.msra.mxu0 %v318_v6  ;;  %v210_v24 = vrot.slane %v205_v22, %v209_v21  ;;  %v214_v25 = vrot.slane %v205_v22, %v213_v23 }
  0x32   :  { %161 = vmatprep.subr.bf16.mxu0 %v319_v7  ;;  %p389_p5 = por %p388_p4, %p387_p3 }
  0x34   :  { %p390_p6 = pnand %p389_p5, %p383_p2 }
  0x35   :  { %162 = vmatpush1.bf16.msra.mxu0 %v321_v8 }
  0x36   :  { %163 = vmatprep.subr.bf16.mxu0 %v322_v9 }
  0x39   :  { %164 = vmatpush1.bf16.msra.mxu0 %v324_v10 }
  0x3a   :  { %165 = vmatprep.subr.bf16.mxu0 %v325_v11 }
  0x3d   :  { %166 = vmatpush1.bf16.msra.mxu0 %v327_v12 }
  0x3e   :  { %167 = vmatprep.subr.bf16.mxu0 %v328_v13 }
  0x41   :  { %168 = vmatpush1.bf16.msra.mxu0 %v330_v14 }
  0x42   :  { %169 = vmatprep.subr.bf16.mxu0 %v331_v15 }
  0x45   :  { %170 = vmatpush1.bf16.msra.mxu0 %v333_v16 }
  0x48   :  { %188 = vmatmul.mubr.bf16.vlgmr.msra.gmra.mrb[0].mxu0 %v56_v18 }
 0x11b   :  { %v189_v26 = vpop.f32.mrb[0].mxu0 }
 0x11c   :  { %v217_v27 = vadd.f32 %v210_v24, %v189_v26  ;;  %v191_v28 = vpop.f32.mrb[1].mxu0 }
 0x11d   :  { %v218_v29 = vadd.f32 %v214_v25, %v191_v28  ;;  %v193_v30 = vpop.f32.mrb[2].mxu0 }
 0x11e   :  { %237 = vst [vmem:[#allocation9] sm:$0xff] %v217_v27  ;;  %v194_v31 = vpop.f32.mrb[3].mxu0 }
 0x11f   :  { %v222_v32 = vand.u32 2147483647, %v218_v29 }
 0x120   :  { %393 = shalt.err (!%p390_p6)
}
 0x121   :  { %s394_s27 = scalar_lea.hbm %s577_s5, 128 }
 0x122   :  { %p395_p7 = scmp.ne.s32.totalorder %s577_s5, %s394_s27  ;;  %p398_p8 = scmp.lt.u32.totalorder %s394_s27, %s577_s5 }
 0x124   :  { %p400_p9 = pnand %p398_p8, %p395_p7 }
 0x126   :  { %403 = shalt.err (!%p400_p9)
}
 0x127   :  { %262 = dma.vmem_to_hbm [thread:$0]  %s260_s24, 128, %s577_s5, [#allocation10]   ;;  %v223_v33 = vsub.f32 0.0, %v222_v32  ;;  %v219_v43 = vmax.f32 %v218_v29, 0.0  ;;  %v239_v46 = vld [vmem:[%s575_s3] sm:$0xff]  ;;  %vm220_vm1 = vcmp.ne.f32.partialorder %v218_v29, %v218_v29 }
 0x128   :  { %s462_s10 = smov [#allocation11]   ;;  %s463_s13 = smov [#allocation8]  }
 0x129   :  { %v224_v34 = vmul.f32 1.442695, %v223_v33  ;;  %s269_s11 = sshll.u32 %s462_s10, 4  ;;  %s249_s14 = sshll.u32 %s463_s13, 4  ;;  %s270_s11 = int_to_ptr.vmem [resolvable:$true] %s269_s11  ;;  %s250_s14 = int_to_ptr.vmem [resolvable:$true] %s249_s14 }
 0x12a   :  { %s404_s15 = scalar_lea.vmem %s270_s11, 128  ;;  %p409_p11 = scmp.lt.s32.totalorder %s270_s11, %s270_s11 }
 0x12b   :  { %334 = vpow2.f32 %v224_v34  ;;  %p405_p10 = scmp.ne.s32.totalorder %s270_s11, %s404_s15  ;;  %p410_p12 = scmp.lt.s32.totalorder %s404_s15, %s404_s15 }
 0x12d   :  { %p411_p13 = por %p410_p12, %p409_p11 }
 0x12f   :  { %p412_p0 = pnand %p411_p13, %p405_p10 }
 0x135   :  { %v335_v35 = vpop.eup %334 }
 0x136   :  { %v226_v36 = vadd.f32 1.0, %v335_v35  ;;  %v229_v37 = vmul.f32 -0.5, %v335_v35  ;;  %v232_v39 = vand.u32 2147483647, %v335_v35 }
 0x138   :  { %336 = vlog2.f32 %v226_v36  ;;  %v230_v38 = vadd.f32 1.0, %v229_v37  ;;  %vm233_vm0 = vcmp.lt.f32.partialorder %v232_v39, 0.0004427343 }
 0x13a   :  { %v231_v42 = vmul.f32 %v335_v35, %v230_v38 }
 0x142   :  { %v337_v40 = vpop.eup %336 }
 0x143   :  { %v228_v41 = vmul.f32 0.6931472, %v337_v40 }
 0x145   :  { %v234_v44 = vsel %vm233_vm0, %v231_v42, %v228_v41 }
 0x146   :  { %v235_v45 = vadd.f32 %v234_v44, %v219_v43 }
 0x148   :  { %v236_v47 = vsel %vm220_vm1, %v218_v29, %v235_v45 }
 0x149   :  { %v240_v48 = vmul.f32 %v239_v46, %v236_v47  ;;  %238 = vst [vmem:[#allocation11] sm:$0xff] %v236_v47 }
 0x14a   :  { %415 = shalt.err (!%p412_p0)
}
 0x14b   :  { %s416_s18 = scalar_lea.hbm %s578_s6, 128 }
 0x14c   :  { %p417_p1 = scmp.ne.s32.totalorder %s578_s6, %s416_s18  ;;  %p420_p2 = scmp.lt.u32.totalorder %s416_s18, %s578_s6 }
 0x14e   :  { %p422_p3 = pnand %p420_p2, %p417_p1 }
 0x150   :  { %425 = shalt.err (!%p422_p3)
}
 0x151   :  { %272 = dma.vmem_to_hbm [thread:$0]  %s270_s11, 128, %s578_s6, [#allocation10]   ;;  %v241_v49 = vadd.f32 %v240_v48, %v217_v27 }
 0x152   :  { %s426_s22 = scalar_lea.vmem %s250_s14, 128  ;;  %p431_p5 = scmp.lt.s32.totalorder %s250_s14, %s250_s14 }
 0x153   :  { %242 = vst [vmem:[#allocation8] sm:$0xff] %v241_v49  ;;  %p427_p4 = scmp.ne.s32.totalorder %s250_s14, %s426_s22  ;;  %p432_p6 = scmp.lt.s32.totalorder %s426_s22, %s426_s22 }
 0x155   :  { %p433_p7 = por %p432_p6, %p431_p5 }
 0x157   :  { %p434_p8 = pnand %p433_p7, %p427_p4 }
 0x159   :  { %437 = shalt.err (!%p434_p8)
}
 0x15a   :  { %s438_s25 = scalar_lea.hbm %s576_s4, 128 }
 0x15b   :  { %p439_p9 = scmp.ne.s32.totalorder %s576_s4, %s438_s25  ;;  %p442_p10 = scmp.lt.u32.totalorder %s438_s25, %s576_s4 }
 0x15d   :  { %p444_p11 = pnand %p442_p10, %p439_p9 }
 0x15f   :  { %447 = shalt.err (!%p444_p11)
}
 0x160   :  { %252 = dma.vmem_to_hbm [thread:$0]  %s250_s14, 128, %s576_s4, [#allocation5]  }
 0x161   :  { %452 = dma.done.wait [#allocation5], 128  }
 0x162   :  { %453 = vsyncadd [#allocation5], 4294967168 }
 0x163   :  { %454 = dma.done.wait [#allocation10], 256  }
 0x164   :  { %455 = vsyncadd [#allocation10], 4294967040 }
 0x165   :  { %282 = vsyncpa [#allocation4], 1 }
 0x166   :  { %283 = vsyncpa [#allocation7], 1 }
 0x167   :  { %284 = vsyncpa [#allocation5], 1 }
 0x168   :  { %285 = vsyncpa [#allocation10], 1 }

</bundles_post_ra>
